<compile_context>
chip_gen: v7x
topology: tpu7x:2x2x1
jax: 0.10.0
libtpu: 0.0.40
codegen_flags: <defaults>
</compile_context>

<pallas_src>
import functools

import jax
import jax.numpy as jnp
from jax.experimental import pallas as pl
from jax.experimental.pallas import tpu as pltpu


def _conv_block_kernel(x_ref, w_ref, b_ref, o_ref, *,
                       width, kh_size, kw_size, pad_w, k_pad):
    """BB batch images per grid step.

    x_ref : (BB, Cin, L_pad)      bf16, flattened zero-padded input rows
    w_ref : (Cout, K_pad)         bf16, K ordered (kh, kw, cin), zero-padded
    b_ref : (Cout, 1)             f32
    o_ref : (BB, Cout, Ho*Wo)     f32  (lane-dense: Ho*Wo on the lane axis)
    """
    bb = o_ref.shape[0]
    cin = x_ref.shape[1]
    howo = o_ref.shape[2]
    n = bb * howo

    # Lane index -> column position inside an output row (howo % width == 0,
    # so this is correct across the per-image lane chunks as well).
    lane = jax.lax.broadcasted_iota(jnp.int32, (1, n), 1)
    xcol = lane % width

    # Hoisted edge-wrap masks: 2*pad_w distinct masks total, built once and
    # broadcast once (JAX does not CSE broadcast/compare chains).
    left_masks = {
        kw: jnp.broadcast_to(xcol >= (pad_w - kw), (cin, n))
        for kw in range(pad_w)
    }
    right_masks = {
        kw: jnp.broadcast_to(xcol < (width + pad_w - kw), (cin, n))
        for kw in range(pad_w + 1, kw_size)
    }

    taps = []
    for kh in range(kh_size):
        for kw in range(kw_size):
            # "same" conv + flattened layout => every tap is a constant lane
            # shift of the padded input (start = kh*W + kw).  Slice per image
            # (never across image boundaries), then lane-concat across images.
            start = kh * width + kw
            per_img = [x_ref[img, :, pl.ds(start, howo)] for img in range(bb)]
            tap = per_img[0] if bb == 1 else jnp.concatenate(per_img, axis=1)
            if kw < pad_w:                                  # left-edge wrap
                tap = jnp.where(left_masks[kw], tap, jnp.zeros_like(tap))
            elif kw > pad_w:                                # right-edge wrap
                tap = jnp.where(right_masks[kw], tap, jnp.zeros_like(tap))
            taps.append(tap)

    # Pad K up to the bf16 sublane pack (36 -> 48) with zero rows so the MXU
    # contraction sees an aligned tile.
    k_taps = kh_size * kw_size * cin
    if k_pad > k_taps:
        taps.append(jnp.zeros((k_pad - k_taps, n), dtype=x_ref.dtype))
    patch = jnp.concatenate(taps, axis=0)                    # (K_pad, BB*Ho*Wo)

    # Single MXU contraction for the whole step, f32 accumulation.
    acc = jnp.dot(w_ref[...], patch,
                  preferred_element_type=jnp.float32)        # (Cout, BB*Ho*Wo)

    # f32 epilogue: bias + ReLU, lane-dense stores (256-lane aligned slices).
    acc = jnp.maximum(acc + b_ref[...], 0.0)
    for img in range(bb):
        o_ref[img] = acc[:, img * howo:(img + 1) * howo].astype(o_ref.dtype)


def conv_block(x_nchw, weight, bias, *, stride=1, padding=1, steps=1):
    """ConvBlock forward: Conv2d(weight, stride, padding) + ReLU.

    x_nchw : (B, Cin, H, W)   float32
    weight : (Cout, Cin, KH, KW)  (PyTorch layout)
    bias   : (Cout,)
    steps  : grid size (images are split evenly across steps).  Use 1 on
             single-TensorCore chips (v5e/v6e); 2 on v7x to feed both TCs.
    returns: (B, Cout, H, W)
    """
    b, cin, h, w = x_nchw.shape
    cout, cin_w, kh_size, kw_size = weight.shape
    assert cin == cin_w

    sh, sw = (stride, stride) if isinstance(stride, int) else tuple(stride)
    pad_h, pad_w = (padding, padding) if isinstance(padding, int) else tuple(padding)
    # This kernel is specialized to the ConvBlock configuration: stride 1,
    # "same" padding (output size == input size).
    assert sh == 1 and sw == 1, "kernel specialized to stride=1"
    assert kh_size == 2 * pad_h + 1 and kw_size == 2 * pad_w + 1, \
        "kernel specialized to 'same' padding (e.g. 3x3 / pad 1)"
    assert b % steps == 0, "steps must divide the batch size"
    bb = b // steps                                   # images per grid step

    ho, wo = h, w
    howo = ho * wo
    front = pad_h * w + pad_w                         # flat zero pad per side
    L = h * w + 2 * front
    L_pad = ((L + 127) // 128) * 128                  # lane-aligned HBM rows

    # Host glue: bf16 cast + ONE flat pad.  No transposes, no NHWC round trip.
    x_flat = x_nchw.astype(jnp.bfloat16).reshape(b, cin, h * w)
    x_flat = jnp.pad(x_flat, ((0, 0), (0, 0), (front, L_pad - h * w - front)))

    # Weight -> (Cout, K_pad) with K ordered (kh, kw, cin), zero-padded to a
    # multiple of the bf16 16-row sublane pack; tiny host relayout.
    k_taps = kh_size * kw_size * cin
    k_pad = ((k_taps + 15) // 16) * 16
    w_mat = jnp.transpose(weight, (0, 2, 3, 1)) \
               .reshape(cout, k_taps).astype(jnp.bfloat16)
    w_mat = jnp.pad(w_mat, ((0, 0), (0, k_pad - k_taps)))
    b2d = bias.reshape(cout, 1).astype(jnp.float32)

    kernel = functools.partial(
        _conv_block_kernel, width=w, kh_size=kh_size, kw_size=kw_size,
        pad_w=pad_w, k_pad=k_pad)

    out = pl.pallas_call(
        kernel,
        out_shape=jax.ShapeDtypeStruct((b, cout, howo), x_nchw.dtype),
        grid=(steps,),
        in_specs=[
            pl.BlockSpec((bb, cin, L_pad), lambda i: (i, 0, 0)),
            pl.BlockSpec((cout, k_pad), lambda i: (0, 0)),
            pl.BlockSpec((cout, 1), lambda i: (0, 0)),
        ],
        out_specs=pl.BlockSpec((bb, cout, howo), lambda i: (i, 0, 0)),
        compiler_params=pltpu.CompilerParams(
            dimension_semantics=("parallel",)),
    )(x_flat, w_mat, b2d)

    return out.reshape(b, cout, ho, wo)               # free reshape, already NCHW


if __name__ == "__main__":
    # Small shapes consistent with ConvBlock(input_channels=4, output_channels=8)
    B, CIN, COUT, H, W = 2, 4, 8, 16, 16
    KH = KW = 3

    key = jax.random.PRNGKey(0)
    kx, kw_, kb = jax.random.split(key, 3)

    x = jax.random.normal(kx, (B, CIN, H, W), dtype=jnp.float32)

    fan_in = CIN * KH * KW
    bound = 1.0 / (fan_in ** 0.5)
    weight = jax.random.uniform(
        kw_, (COUT, CIN, KH, KW), minval=-bound, maxval=bound, dtype=jnp.float32
    )
    bias = jax.random.uniform(
        kb, (COUT,), minval=-bound, maxval=bound, dtype=jnp.float32
    )

    out = conv_block(x, weight, bias, stride=1, padding=1)
    out = jax.block_until_ready(out)
    assert out.shape == (B, COUT, H, W)

    # Reference with the same bf16-rounded MXU inputs and f32 accumulation.
    xq = x.astype(jnp.bfloat16).astype(jnp.float32)
    wq = weight.astype(jnp.bfloat16).astype(jnp.float32)
    ref = jax.lax.conv_general_dilated(
        xq, wq, window_strides=(1, 1), padding=((1, 1), (1, 1)),
        dimension_numbers=("NCHW", "OIHW", "NCHW"),
        precision=jax.lax.Precision.HIGHEST,
    ) + bias.reshape(1, COUT, 1, 1)
    ref = jnp.maximum(ref, 0.0)
    assert jnp.allclose(out, ref, atol=1e-2, rtol=1e-2), \
        float(jnp.max(jnp.abs(out - ref)))

    print("KERNEL_OK")
</pallas_src>

<mosaic_0001>
module attributes {stable_mosaic.version = 11 : i64} {
  func.func @_conv_block_kernel(%arg0: i32, %arg1: memref<2x4x384xbf16, #tpu.memory_space<vmem>>, %arg2: memref<8x48xbf16, #tpu.memory_space<vmem>>, %arg3: memref<8x1xf32, #tpu.memory_space<vmem>>, %arg4: memref<2x8x256xf32, #tpu.memory_space<vmem>>) attributes {dimension_semantics = [#tpu.dimension_semantics<parallel>], iteration_bounds = array<i64: 1>, scalar_prefetch = 0 : i64, scratch_operands = 0 : i64, tpu.core_type = #tpu.core_type<tc>, window_params = [{transform_indices = @transform_0, window_bounds = array<i64: 2, 4, 384>}, {pipeline_mode = #tpu.pipeline_mode<synchronous>, transform_indices = @transform_1, window_bounds = array<i64: 8, 48>}, {pipeline_mode = #tpu.pipeline_mode<synchronous>, transform_indices = @transform_2, window_bounds = array<i64: 8, 1>}, {transform_indices = @transform_3, window_bounds = array<i64: 2, 8, 256>}]} {
    %0 = tpu.iota {dimensions = array<i32: 1>} : vector<1x512xi32>
    %c16_i32 = arith.constant 16 : i32
    %c0_i32 = arith.constant 0 : i32
    %1 = arith.cmpi eq, %c16_i32, %c0_i32 : i32
    %c1_i32 = arith.constant 1 : i32
    %2 = arith.select %1, %c1_i32, %c16_i32 : i32
    %3 = vector.broadcast %2 : i32 to vector<1x512xi32>
    %4 = arith.remsi %0, %3 : vector<1x512xi32>
    %c0_i32_0 = arith.constant 0 : i32
    %5 = vector.broadcast %c0_i32_0 : i32 to vector<1x512xi32>
    %6 = arith.cmpi ne, %4, %5 : vector<1x512xi32>
    %c0_i32_1 = arith.constant 0 : i32
    %7 = vector.broadcast %c0_i32_1 : i32 to vector<1x512xi32>
    %8 = arith.cmpi slt, %4, %7 : vector<1x512xi32>
    %c0_i32_2 = arith.constant 0 : i32
    %9 = arith.cmpi slt, %2, %c0_i32_2 : i32
    %10 = vector.broadcast %9 : i1 to vector<1x512xi1>
    %11 = vector.broadcast %10 : vector<1x512xi1> to vector<1x512xi1>
    %12 = arith.xori %8, %11 : vector<1x512xi1>
    %13 = arith.andi %12, %6 : vector<1x512xi1>
    %14 = vector.broadcast %2 : i32 to vector<1x512xi32>
    %15 = arith.addi %4, %14 : vector<1x512xi32>
    %16 = arith.select %13, %15, %4 : vector<1x512xi1>, vector<1x512xi32>
    %c1_i32_3 = arith.constant 1 : i32
    %17 = vector.broadcast %c1_i32_3 : i32 to vector<1x512xi32>
    %18 = arith.cmpi sge, %16, %17 : vector<1x512xi32>
    %19 = vector.shape_cast %18 : vector<1x512xi1> to vector<1x512xi1>
    %20 = vector.broadcast %19 : vector<1x512xi1> to vector<4x512xi1>
    %c15_i32 = arith.constant 15 : i32
    %21 = vector.broadcast %c15_i32 : i32 to vector<1x512xi32>
    %22 = arith.cmpi slt, %16, %21 : vector<1x512xi32>
    %23 = vector.shape_cast %22 : vector<1x512xi1> to vector<1x512xi1>
    %24 = vector.broadcast %23 : vector<1x512xi1> to vector<4x512xi1>
    %c0 = arith.constant 0 : index
    %c0_4 = arith.constant 0 : index
    %c0_5 = arith.constant 0 : index
    %25 = vector.load %arg1[%c0, %c0_4, %c0_5] : memref<2x4x384xbf16, #tpu.memory_space<vmem>>, vector<1x4x256xbf16>
    %26 = vector.shape_cast %25 : vector<1x4x256xbf16> to vector<4x256xbf16>
    %c1 = arith.constant 1 : index
    %c0_6 = arith.constant 0 : index
    %c0_7 = arith.constant 0 : index
    %27 = vector.load %arg1[%c1, %c0_6, %c0_7] : memref<2x4x384xbf16, #tpu.memory_space<vmem>>, vector<1x4x256xbf16>
    %28 = vector.shape_cast %27 : vector<1x4x256xbf16> to vector<4x256xbf16>
    %29 = tpu.concatenate %26, %28 in 1 : vector<4x256xbf16>, vector<4x256xbf16> -> vector<4x512xbf16>
    %cst = arith.constant 0.000000e+00 : bf16
    %30 = vector.broadcast %cst : bf16 to vector<4x512xbf16>
    %31 = arith.select %20, %29, %30 : vector<4x512xi1>, vector<4x512xbf16>
    %c0_8 = arith.constant 0 : index
    %c0_9 = arith.constant 0 : index
    %c1_10 = arith.constant 1 : index
    %32 = vector.load %arg1[%c0_8, %c0_9, %c1_10] : memref<2x4x384xbf16, #tpu.memory_space<vmem>>, vector<1x4x256xbf16>
    %33 = vector.shape_cast %32 : vector<1x4x256xbf16> to vector<4x256xbf16>
    %c1_11 = arith.constant 1 : index
    %c0_12 = arith.constant 0 : index
    %c1_13 = arith.constant 1 : index
    %34 = vector.load %arg1[%c1_11, %c0_12, %c1_13] : memref<2x4x384xbf16, #tpu.memory_space<vmem>>, vector<1x4x256xbf16>
    %35 = vector.shape_cast %34 : vector<1x4x256xbf16> to vector<4x256xbf16>
    %36 = tpu.concatenate %33, %35 in 1 : vector<4x256xbf16>, vector<4x256xbf16> -> vector<4x512xbf16>
    %c0_14 = arith.constant 0 : index
    %c0_15 = arith.constant 0 : index
    %c2 = arith.constant 2 : index
    %37 = vector.load %arg1[%c0_14, %c0_15, %c2] : memref<2x4x384xbf16, #tpu.memory_space<vmem>>, vector<1x4x256xbf16>
    %38 = vector.shape_cast %37 : vector<1x4x256xbf16> to vector<4x256xbf16>
    %c1_16 = arith.constant 1 : index
    %c0_17 = arith.constant 0 : index
    %c2_18 = arith.constant 2 : index
    %39 = vector.load %arg1[%c1_16, %c0_17, %c2_18] : memref<2x4x384xbf16, #tpu.memory_space<vmem>>, vector<1x4x256xbf16>
    %40 = vector.shape_cast %39 : vector<1x4x256xbf16> to vector<4x256xbf16>
    %41 = tpu.concatenate %38, %40 in 1 : vector<4x256xbf16>, vector<4x256xbf16> -> vector<4x512xbf16>
    %cst_19 = arith.constant 0.000000e+00 : bf16
    %42 = vector.broadcast %cst_19 : bf16 to vector<4x512xbf16>
    %43 = arith.select %24, %41, %42 : vector<4x512xi1>, vector<4x512xbf16>
    %c0_20 = arith.constant 0 : index
    %c0_21 = arith.constant 0 : index
    %c16 = arith.constant 16 : index
    %44 = vector.load %arg1[%c0_20, %c0_21, %c16] : memref<2x4x384xbf16, #tpu.memory_space<vmem>>, vector<1x4x256xbf16>
    %45 = vector.shape_cast %44 : vector<1x4x256xbf16> to vector<4x256xbf16>
    %c1_22 = arith.constant 1 : index
    %c0_23 = arith.constant 0 : index
    %c16_24 = arith.constant 16 : index
    %46 = vector.load %arg1[%c1_22, %c0_23, %c16_24] : memref<2x4x384xbf16, #tpu.memory_space<vmem>>, vector<1x4x256xbf16>
    %47 = vector.shape_cast %46 : vector<1x4x256xbf16> to vector<4x256xbf16>
    %48 = tpu.concatenate %45, %47 in 1 : vector<4x256xbf16>, vector<4x256xbf16> -> vector<4x512xbf16>
    %cst_25 = arith.constant 0.000000e+00 : bf16
    %49 = vector.broadcast %cst_25 : bf16 to vector<4x512xbf16>
    %50 = arith.select %20, %48, %49 : vector<4x512xi1>, vector<4x512xbf16>
    %c0_26 = arith.constant 0 : index
    %c0_27 = arith.constant 0 : index
    %c17 = arith.constant 17 : index
    %51 = vector.load %arg1[%c0_26, %c0_27, %c17] : memref<2x4x384xbf16, #tpu.memory_space<vmem>>, vector<1x4x256xbf16>
    %52 = vector.shape_cast %51 : vector<1x4x256xbf16> to vector<4x256xbf16>
    %c1_28 = arith.constant 1 : index
    %c0_29 = arith.constant 0 : index
    %c17_30 = arith.constant 17 : index
    %53 = vector.load %arg1[%c1_28, %c0_29, %c17_30] : memref<2x4x384xbf16, #tpu.memory_space<vmem>>, vector<1x4x256xbf16>
    %54 = vector.shape_cast %53 : vector<1x4x256xbf16> to vector<4x256xbf16>
    %55 = tpu.concatenate %52, %54 in 1 : vector<4x256xbf16>, vector<4x256xbf16> -> vector<4x512xbf16>
    %c0_31 = arith.constant 0 : index
    %c0_32 = arith.constant 0 : index
    %c18 = arith.constant 18 : index
    %56 = vector.load %arg1[%c0_31, %c0_32, %c18] : memref<2x4x384xbf16, #tpu.memory_space<vmem>>, vector<1x4x256xbf16>
    %57 = vector.shape_cast %56 : vector<1x4x256xbf16> to vector<4x256xbf16>
    %c1_33 = arith.constant 1 : index
    %c0_34 = arith.constant 0 : index
    %c18_35 = arith.constant 18 : index
    %58 = vector.load %arg1[%c1_33, %c0_34, %c18_35] : memref<2x4x384xbf16, #tpu.memory_space<vmem>>, vector<1x4x256xbf16>
    %59 = vector.shape_cast %58 : vector<1x4x256xbf16> to vector<4x256xbf16>
    %60 = tpu.concatenate %57, %59 in 1 : vector<4x256xbf16>, vector<4x256xbf16> -> vector<4x512xbf16>
    %cst_36 = arith.constant 0.000000e+00 : bf16
    %61 = vector.broadcast %cst_36 : bf16 to vector<4x512xbf16>
    %62 = arith.select %24, %60, %61 : vector<4x512xi1>, vector<4x512xbf16>
    %c0_37 = arith.constant 0 : index
    %c0_38 = arith.constant 0 : index
    %c32 = arith.constant 32 : index
    %63 = vector.load %arg1[%c0_37, %c0_38, %c32] : memref<2x4x384xbf16, #tpu.memory_space<vmem>>, vector<1x4x256xbf16>
    %64 = vector.shape_cast %63 : vector<1x4x256xbf16> to vector<4x256xbf16>
    %c1_39 = arith.constant 1 : index
    %c0_40 = arith.constant 0 : index
    %c32_41 = arith.constant 32 : index
    %65 = vector.load %arg1[%c1_39, %c0_40, %c32_41] : memref<2x4x384xbf16, #tpu.memory_space<vmem>>, vector<1x4x256xbf16>
    %66 = vector.shape_cast %65 : vector<1x4x256xbf16> to vector<4x256xbf16>
    %67 = tpu.concatenate %64, %66 in 1 : vector<4x256xbf16>, vector<4x256xbf16> -> vector<4x512xbf16>
    %cst_42 = arith.constant 0.000000e+00 : bf16
    %68 = vector.broadcast %cst_42 : bf16 to vector<4x512xbf16>
    %69 = arith.select %20, %67, %68 : vector<4x512xi1>, vector<4x512xbf16>
    %c0_43 = arith.constant 0 : index
    %c0_44 = arith.constant 0 : index
    %c33 = arith.constant 33 : index
    %70 = vector.load %arg1[%c0_43, %c0_44, %c33] : memref<2x4x384xbf16, #tpu.memory_space<vmem>>, vector<1x4x256xbf16>
    %71 = vector.shape_cast %70 : vector<1x4x256xbf16> to vector<4x256xbf16>
    %c1_45 = arith.constant 1 : index
    %c0_46 = arith.constant 0 : index
    %c33_47 = arith.constant 33 : index
    %72 = vector.load %arg1[%c1_45, %c0_46, %c33_47] : memref<2x4x384xbf16, #tpu.memory_space<vmem>>, vector<1x4x256xbf16>
    %73 = vector.shape_cast %72 : vector<1x4x256xbf16> to vector<4x256xbf16>
    %74 = tpu.concatenate %71, %73 in 1 : vector<4x256xbf16>, vector<4x256xbf16> -> vector<4x512xbf16>
    %c0_48 = arith.constant 0 : index
    %c0_49 = arith.constant 0 : index
    %c34 = arith.constant 34 : index
    %75 = vector.load %arg1[%c0_48, %c0_49, %c34] : memref<2x4x384xbf16, #tpu.memory_space<vmem>>, vector<1x4x256xbf16>
    %76 = vector.shape_cast %75 : vector<1x4x256xbf16> to vector<4x256xbf16>
    %c1_50 = arith.constant 1 : index
    %c0_51 = arith.constant 0 : index
    %c34_52 = arith.constant 34 : index
    %77 = vector.load %arg1[%c1_50, %c0_51, %c34_52] : memref<2x4x384xbf16, #tpu.memory_space<vmem>>, vector<1x4x256xbf16>
    %78 = vector.shape_cast %77 : vector<1x4x256xbf16> to vector<4x256xbf16>
    %79 = tpu.concatenate %76, %78 in 1 : vector<4x256xbf16>, vector<4x256xbf16> -> vector<4x512xbf16>
    %cst_53 = arith.constant 0.000000e+00 : bf16
    %80 = vector.broadcast %cst_53 : bf16 to vector<4x512xbf16>
    %81 = arith.select %24, %79, %80 : vector<4x512xi1>, vector<4x512xbf16>
    %cst_54 = arith.constant 0.000000e+00 : bf16
    %82 = vector.broadcast %cst_54 : bf16 to vector<12x512xbf16>
    %83 = tpu.concatenate %31, %36, %43, %50, %55, %62, %69, %74, %81, %82 in 0 : vector<4x512xbf16>, vector<4x512xbf16>, vector<4x512xbf16>, vector<4x512xbf16>, vector<4x512xbf16>, vector<4x512xbf16>, vector<4x512xbf16>, vector<4x512xbf16>, vector<4x512xbf16>, vector<12x512xbf16> -> vector<48x512xbf16>
    %c0_55 = arith.constant 0 : index
    %c0_56 = arith.constant 0 : index
    %84 = vector.load %arg2[%c0_55, %c0_56] : memref<8x48xbf16, #tpu.memory_space<vmem>>, vector<8x48xbf16>
    %cst_57 = arith.constant dense<0.000000e+00> : vector<8x512xf32>
    %85 = tpu.matmul %84, %83, %cst_57 {dimension_numbers = #tpu.dot_dimension_numbers<[1], [0], [0], [1], [0, 0, 1, 1], [], []>} : vector<8x48xbf16>, vector<48x512xbf16>, vector<8x512xf32> -> vector<8x512xf32>
    %c0_58 = arith.constant 0 : index
    %c0_59 = arith.constant 0 : index
    %86 = vector.load %arg3[%c0_58, %c0_59] : memref<8x1xf32, #tpu.memory_space<vmem>>, vector<8x1xf32>
    %87 = vector.broadcast %86 : vector<8x1xf32> to vector<8x512xf32>
    %88 = arith.addf %85, %87 : vector<8x512xf32>
    %cst_60 = arith.constant 0.000000e+00 : f32
    %89 = vector.broadcast %cst_60 : f32 to vector<8x512xf32>
    %90 = arith.maximumf %88, %89 : vector<8x512xf32>
    %91 = vector.extract_strided_slice %90 {offsets = [0, 0], sizes = [8, 256], strides = [1, 1]} : vector<8x512xf32> to vector<8x256xf32>
    %c0_61 = arith.constant 0 : index
    %c0_62 = arith.constant 0 : index
    %c0_63 = arith.constant 0 : index
    %92 = vector.load %arg4[%c0_61, %c0_62, %c0_63] : memref<2x8x256xf32, #tpu.memory_space<vmem>>, vector<1x8x256xf32>
    %93 = vector.shape_cast %92 : vector<1x8x256xf32> to vector<8x256xf32>
    %94 = vector.shape_cast %91 : vector<8x256xf32> to vector<1x8x256xf32>
    tpu.vector_store %arg4[%c0_61, %c0_62, %c0_63], %94 {strides = array<i32>} : memref<2x8x256xf32, #tpu.memory_space<vmem>>, vector<1x8x256xf32>,
    %95 = vector.extract_strided_slice %90 {offsets = [0, 256], sizes = [8, 256], strides = [1, 1]} : vector<8x512xf32> to vector<8x256xf32>
    %c1_64 = arith.constant 1 : index
    %c0_65 = arith.constant 0 : index
    %c0_66 = arith.constant 0 : index
    %96 = vector.load %arg4[%c1_64, %c0_65, %c0_66] : memref<2x8x256xf32, #tpu.memory_space<vmem>>, vector<1x8x256xf32>
    %97 = vector.shape_cast %96 : vector<1x8x256xf32> to vector<8x256xf32>
    %98 = vector.shape_cast %95 : vector<8x256xf32> to vector<1x8x256xf32>
    tpu.vector_store %arg4[%c1_64, %c0_65, %c0_66], %98 {strides = array<i32>} : memref<2x8x256xf32, #tpu.memory_space<vmem>>, vector<1x8x256xf32>,
    return
  }
  func.func @transform_0(%arg0: i32) -> (i32, i32, i32) {
    %c0_i32 = arith.constant 0 : i32
    %c0_i32_0 = arith.constant 0 : i32
    %c0_i32_1 = arith.constant 0 : i32
    return %arg0, %c0_i32, %c0_i32_0 : i32, i32, i32
  }
  func.func @transform_1(%arg0: i32) -> (i32, i32) {
    %c0_i32 = arith.constant 0 : i32
    %c0_i32_0 = arith.constant 0 : i32
    %c0_i32_1 = arith.constant 0 : i32
    return %c0_i32, %c0_i32_0 : i32, i32
  }
  func.func @transform_2(%arg0: i32) -> (i32, i32) {
    %c0_i32 = arith.constant 0 : i32
    %c0_i32_0 = arith.constant 0 : i32
    %c0_i32_1 = arith.constant 0 : i32
    return %c0_i32, %c0_i32_0 : i32, i32
  }
  func.func @transform_3(%arg0: i32) -> (i32, i32, i32) {
    %c0_i32 = arith.constant 0 : i32
    %c0_i32_0 = arith.constant 0 : i32
    %c0_i32_1 = arith.constant 0 : i32
    return %arg0, %c0_i32, %c0_i32_0 : i32, i32, i32
  }
}

</mosaic_0001>

<bundles_post_ra>
// kernel: tpu_custom_call.1
= control target key start
LH: loop header
LB: loop body
LE: loop exit
PB: predicated region body
PF: predicated region fallthrough
CT: control target
= control target key end

     0   :  { %8 = vsyncpa [#allocation3], 0  ;;  %s1068_s0 = inlined_call_operand.hbm [shape: bf16[2,4,384], index: 0, kind: input, shape index: {}]   ;;  %s1069_s1 = inlined_call_operand.vmem [shape: bf16[8,48], index: 1, kind: input, shape index: {}]   ;;  %s1070_s2 = inlined_call_operand.vmem [shape: f32[8,1], index: 2, kind: input, shape index: {}]   ;;  %s1071_s3 = inlined_call_operand.hbm [shape: f32[2,8,256], index: 3, kind: output, shape index: {}]  }
   0x1   :  { %9 = vsyncpa [#allocation4], 0  ;;  %s709_s12 = smov [#allocation2]   ;;  %s661_s16 = scalar_lea.hbm %s1068_s0, 192 }
   0x2   :  { %s15_s13 = sshll.u32 %s709_s12, 4  ;;  %p662_p0 = scmp.ne.s32.totalorder %s1068_s0, %s661_s16  ;;  %s16_s13 = int_to_ptr.vmem [resolvable:$true] %s15_s13 }
   0x3   :  { %p665_p1 = scmp.lt.u32.totalorder %s661_s16, %s1068_s0 }
   0x5   :  { %p667_p2 = pnand %p665_p1, %p662_p0 }
   0x7   :  { %670 = shalt.err (!%p667_p2)
}
   0x8   :  { %s671_s21 = scalar_lea.vmem %s16_s13, 192  ;;  %p676_p4 = scmp.lt.s32.totalorder %s16_s13, %s16_s13 }
   0x9   :  { %p672_p3 = scmp.ne.s32.totalorder %s16_s13, %s671_s21  ;;  %p677_p5 = scmp.lt.s32.totalorder %s671_s21, %s671_s21 }
   0xb   :  { %p678_p6 = por %p677_p5, %p676_p4 }
   0xd   :  { %p679_p7 = pnand %p678_p6, %p672_p3 }
   0xf   :  { %682 = shalt.err (!%p679_p7)
}
  0x10   :  { %s710_s22 = smov 96   ;;  %s711_s23 = smov 6  }
  0x11   :  { %21 = dma.hbm_to_vmem [thread:$0]  %s1068_s0, 192, %s16_s13, [#allocation3], %s710_s22, %s710_s22, %s711_s23  }
  0x12   :  { %705 = dma.done.wait [#allocation3], 192  }
  0x13   :  { %706 = vsyncadd [#allocation3], 4294967104  ;;  %v32_v0 = vlaneseq  ;;  %v712_v1 = vmov 1983009808   ;;  %v713_v5 = vmov 0   ;;  %s714_s0 = smov 127  }
  0x14   :  { %v167_v2 = vunpack.c.l.s4 %v712_v1  ;;  %561 = vmatprep.mubr.bf16.mxu0 %v713_v5  ;;  %602 = vmatprep.mubr.bf16.mxu1 %v713_v5  ;;  %v163_v15 = vld [vmem:[#allocation2 + $0x6] sm:$0x3f]  ;;  %v162_v16 = vld [vmem:[#allocation2] sm:$0x3f]  ;;  %s715_s26 = smov 126   ;;  %s716_s27 = smov 112  }
  0x15   :  { %v139_v3 = vshrl.u32 %v32_v0, 7  ;;  %v33_v4 = vand.u32 127, %v32_v0  ;;  %658 = vset.pattern.permute.xlu0 %v713_v5  ;;  %v191_v21 = vcombine.high %v163_v15, %v163_v15  ;;  %v165_v22 = vcombine.high %v162_v16, %v162_v16  ;;  %s717_s28 = smov 110   ;;  %s718_s29 = smov 111   ;;  %v519_v44 = vld [vmem:[%s1070_s2] sm:$0xff] }
  0x16   :  { %v168_v6 = vunpack.c.0.s8 %v167_v2  ;;  %s719_s30 = smov 95   ;;  %s720_s4 = smov 94   ;;  %v637_v53 = vld.sshfl [vmem:[#allocation2] sm:$0x33 pattern:$0x76325410] }
  0x17   :  { %v34_v7 = vadd.s32 128, %v33_v4  ;;  %v41_v8 = vand.u32 15, %v33_v4  ;;  %v35_v9 = vadd.s32 256, %v33_v4  ;;  %v36_v11 = vadd.s32 384, %v33_v4 }
  0x18   :  { %v171_v10 = vsub.s32 %v168_v6, %v139_v3  ;;  %v790_v28 = vsub.s32 4, %v139_v3  ;;  %v810_v34 = vsub.s32 0, %v139_v3  ;;  %v638_v54 = vld.sshfl [vmem:[#allocation2 + $0x6] sm:$0x33 pattern:$0x76325410]  ;;  %v120_v57 = vcombine.high %v637_v53, %v637_v53 }
  0x19   :  { %v48_v12 = vand.u32 15, %v34_v7  ;;  %vm758_vm0 = vcmp.lt.s32.totalorder %v41_v8, 15  ;;  %v55_v14 = vand.u32 15, %v35_v9  ;;  %v62_v17 = vand.u32 15, %v36_v11 }
  0x1a   :  { %vm762_vm1 = vcmp.ge.s32.totalorder %v41_v8, 1  ;;  %v766_v19 = vrot.slane %v163_v15, %v171_v10  ;;  %v768_v20 = vrot.slane %v162_v16, %v171_v10  ;;  %v794_v29 = vrot.slane %v191_v21, %v171_v10 }
  0x1b   :  { %vm98_vm2 = vcmp.lt.s32.totalorder %v48_v12, 15  ;;  %vm770_vm3 = vcmp.lt.s32.totalorder %v55_v14, 15  ;;  %vm774_vm4 = vcmp.lt.s32.totalorder %v62_v17, 15  ;;  %vm778_vm5 = vcmp.ge.s32.totalorder %v48_v12, 1 }
  0x1c   :  { %v784_v26 = vcombine.high %v766_v19, %v766_v19  ;;  %v788_v27 = vcombine.high %v768_v20, %v768_v20  ;;  %vm236_vm6 = vmpackc.low %vm98_vm2, %vm758_vm0  ;;  %vm87_vm8 = vcmp.ge.s32.totalorder %v55_v14, 1  ;;  %vm88_vm9 = vcmp.ge.s32.totalorder %v62_v17, 1 }
  0x1d   :  { %v796_v30 = vsel %vm236_vm6, 65537, %v713_v5  ;;  %vm237_vm7 = vmpackc.low %vm774_vm4, %vm770_vm3  ;;  %v804_v31 = vrot.slane %v165_v22, %v171_v10  ;;  %vm221_vm12 = vcmask 1031168   ;;  %vm187_vm13 = vcmask 1039360  }
  0x1e   :  { %209 = vrot.lane.b32.xlu1 %v784_v26, %s714_s0  ;;  %183 = vrot.lane.b32.xlu0 %v788_v27, %s714_s0  ;;  %v247_v32 = vrot.slane %v796_v30, %v790_v28  ;;  %v808_v33 = vsel %vm237_vm7, 65537, %v713_v5  ;;  %vm134_vm10 = vmpackc.low %vm778_vm5, %vm762_vm1  ;;  %v243_v43 = vrot.slane %v796_v30, %v810_v34  ;;  %vm438_vm14 = vcmask 1041408  }
  0x1f   :  { %v255_v35 = vrot.slane %v808_v33, %v790_v28  ;;  %v818_v36 = vsel %vm134_vm10, 65537, %v713_v5  ;;  %vm135_vm11 = vmpackc.low %vm88_vm9, %vm87_vm8  ;;  %v251_v42 = vrot.slane %v808_v33, %v810_v34  ;;  %vm451_vm15 = vcmask 1043456  }
  0x20   :  { %v145_v37 = vrot.slane %v818_v36, %v790_v28  ;;  %v822_v38 = vsel %vm135_vm11, 65537, %v713_v5  ;;  %v141_v39 = vrot.slane %v818_v36, %v810_v34  ;;  %v131_v61 = vcombine.high %v638_v54, %v638_v54 }
  0x21   :  { %v153_v40 = vrot.slane %v822_v38, %v790_v28  ;;  %v149_v41 = vrot.slane %v822_v38, %v810_v34  ;;  %vm901_vm1 = vcmp.ne.s16.totalorder %v247_v32, 0  ;;  %vm909_vm2 = vcmp.ne.s16.totalorder %v255_v35, 0 }
  0x22   :  { %211 = vrot.lane.b32.xlu1 %v794_v29, %s714_s0  ;;  %185 = vrot.lane.b32.xlu0 %v804_v31, %s714_s0  ;;  %vm894_vm0 = vcmp.ne.s16.totalorder %v141_v39, 0  ;;  %vm923_vm4 = vcmp.ne.s16.totalorder %v251_v42, 0  ;;  %vm930_vm5 = vcmp.ne.s16.totalorder %v243_v43, 0  ;;  %vm937_vm6 = vcmp.ne.s16.totalorder %v145_v37, 0 }
  0x23   :  { %vm916_vm3 = vcmp.ne.s16.totalorder %v149_v41, 0  ;;  %vm944_vm7 = vcmp.ne.s16.totalorder %v153_v40, 0  ;;  %v158_v11 = vsel %vm894_vm0, %v637_v53, 0  ;;  %vm270_vm8 = vcmask 916480  }
  0x24   :  { %v160_v15 = vsel %vm916_vm3, %v638_v54, 0  ;;  %v159_v22 = vsel %vm937_vm6, %v120_v57, 0  ;;  %vm460_vm9 = vcmask 1045504   ;;  %v161_v41 = vsel %vm944_vm7, %v131_v61, 0 }
  0x25   :  { %vm312_vm10 = vcmask 900096   ;;  %vm337_vm11 = vcmask 785408  }
  0x26   :  { %219 = vrot.lane.b32.xlu1 %v804_v31, %s715_s26  ;;  %217 = vrot.lane.b32.xlu0 %v788_v27, %s715_s26 }
  0x2a   :  { %230 = vrot.lane.b32.xlu1 %v794_v29, %s715_s26  ;;  %228 = vrot.lane.b32.xlu0 %v784_v26, %s715_s26 }
  0x2e   :  { %207 = vrot.lane.b32.xlu1 %v766_v19, %s714_s0  ;;  %181 = vrot.lane.b32.xlu0 %v768_v20, %s714_s0 }
  0x32   :  { %226 = vrot.lane.b32.xlu1 %v766_v19, %s715_s26  ;;  %215 = vrot.lane.b32.xlu0 %v768_v20, %s715_s26 }
  0x36   :  { %268 = vrot.lane.b32.xlu1 %v804_v31, %s716_s27  ;;  %266 = vrot.lane.b32.xlu0 %v788_v27, %s716_s27 }
  0x3a   :  { %279 = vrot.lane.b32.xlu1 %v794_v29, %s716_s27  ;;  %277 = vrot.lane.b32.xlu0 %v784_v26, %s716_s27 }
  0x3e   :  { %275 = vrot.lane.b32.xlu1 %v766_v19, %s716_s27  ;;  %264 = vrot.lane.b32.xlu0 %v768_v20, %s716_s27 }
  0x42   :  { %310 = vrot.lane.b32.xlu1 %v804_v31, %s717_s28  ;;  %308 = vrot.lane.b32.xlu0 %v788_v27, %s717_s28 }
  0x46   :  { %321 = vrot.lane.b32.xlu1 %v794_v29, %s717_s28  ;;  %319 = vrot.lane.b32.xlu0 %v784_v26, %s717_s28 }
  0x4a   :  { %317 = vrot.lane.b32.xlu1 %v766_v19, %s717_s28  ;;  %306 = vrot.lane.b32.xlu0 %v768_v20, %s717_s28 }
  0x4e   :  { %335 = vrot.lane.b32.xlu1 %v804_v31, %s710_s22  ;;  %333 = vrot.lane.b32.xlu0 %v788_v27, %s710_s22 }
  0x52   :  { %346 = vrot.lane.b32.xlu1 %v794_v29, %s710_s22  ;;  %344 = vrot.lane.b32.xlu0 %v784_v26, %s710_s22 }
  0x56   :  { %342 = vrot.lane.b32.xlu1 %v766_v19, %s710_s22  ;;  %331 = vrot.lane.b32.xlu0 %v768_v20, %s710_s22 }
  0x5a   :  { %293 = vrot.lane.b32.xlu1 %v804_v31, %s718_s29  ;;  %291 = vrot.lane.b32.xlu0 %v788_v27, %s718_s29 }
  0x5e   :  { %302 = vrot.lane.b32.xlu1 %v794_v29, %s718_s29  ;;  %300 = vrot.lane.b32.xlu0 %v784_v26, %s718_s29 }
  0x62   :  { %360 = vrot.lane.b32.xlu1 %v804_v31, %s719_s30  ;;  %358 = vrot.lane.b32.xlu0 %v788_v27, %s719_s30 }
  0x66   :  { %369 = vrot.lane.b32.xlu1 %v794_v29, %s719_s30  ;;  %367 = vrot.lane.b32.xlu0 %v784_v26, %s719_s30 }
  0x6a   :  { %298 = vrot.lane.b32.xlu1 %v766_v19, %s718_s29  ;;  %289 = vrot.lane.b32.xlu0 %v768_v20, %s718_s29 }
  0x6e   :  { %365 = vrot.lane.b32.xlu1 %v766_v19, %s719_s30  ;;  %356 = vrot.lane.b32.xlu0 %v768_v20, %s719_s30 }
  0x72   :  { %375 = vrot.lane.b32.xlu1 %v788_v27, %s720_s4  ;;  %373 = vrot.lane.b32.xlu0 %v768_v20, %s720_s4 }
  0x76   :  { %384 = vrot.lane.b32.xlu1 %v766_v19, %s720_s4  ;;  %377 = vrot.lane.b32.xlu0 %v804_v31, %s720_s4 }
  0x7a   :  { %388 = vrot.lane.b32.xlu1 %v794_v29, %s720_s4  ;;  %386 = vrot.lane.b32.xlu0 %v784_v26, %s720_s4 }
  0x7e   :  { %522 = vperm.xlu0 %658, %v519_v44  }
  0x90   :  { %v210_v45 = vpop.permute.xlu1 %209  ;;  %v184_v46 = vpop.permute.xlu0 %183 }
  0x94   :  { %v212_v47 = vpop.permute.xlu1 %211  ;;  %v186_v48 = vpop.permute.xlu0 %185 }
  0x95   :  { %v189_v6 = vsel %vm187_vm13, %v184_v46, %v186_v48  ;;  %v214_v23 = vsel %vm187_vm13, %v210_v45, %v212_v47 }
  0x96   :  { %v399_v19 = vrot.slane %v189_v6, 6  ;;  %v401_v34 = vrot.slane %v214_v23, 6 }
  0x98   :  { %v220_v49 = vpop.permute.xlu1 %219  ;;  %v218_v50 = vpop.permute.xlu0 %217  ;;  %v444_v36 = vsel %vm438_vm14, %v159_v22, %v399_v19 }
  0x99   :  { %v223_v63 = vsel %vm221_vm12, %v218_v50, %v220_v49 }
  0x9a   :  { %v261_v12 = vsel %vm901_vm1, %v223_v63, 0 }
  0x9b   :  { %v407_v24 = vrot.slane %v261_v12, 4 }
  0x9c   :  { %v231_v51 = vpop.permute.xlu1 %230  ;;  %v229_v52 = vpop.permute.xlu0 %228 }
  0x9d   :  { %v233_v16 = vsel %vm221_vm12, %v229_v52, %v231_v51  ;;  %v455_v40 = vsel %vm451_vm15, %v444_v36, %v407_v24 }
  0x9e   :  { %v263_v29 = vsel %vm909_vm2, %v233_v16, 0 }
  0x9f   :  { %v409_v37 = vrot.slane %v263_v29, 4 }
  0xa0   :  { %v208_v55 = vpop.permute.xlu1 %207  ;;  %v182_v56 = vpop.permute.xlu0 %181 }
  0xa1   :  { %v213_v58 = vsel %vm187_vm13, %v208_v55, %v210_v45  ;;  %v188_v59 = vsel %vm187_vm13, %v182_v56, %v184_v46  ;;  %v450_v46 = vsel %vm438_vm14, %v161_v41, %v401_v34  ;;  %vm362_vm13 = vcmask 777216  }
  0xa2   :  { %v400_v7 = vrot.slane %v213_v58, 6  ;;  %v398_v8 = vrot.slane %v188_v59, 6  ;;  %v459_v49 = vsel %vm451_vm15, %v450_v46, %v409_v37 }
  0xa4   :  { %v227_v9 = vpop.permute.xlu1 %226  ;;  %v216_v10 = vpop.permute.xlu0 %215  ;;  %v441_v27 = vsel %vm438_vm14, %v158_v11, %v398_v8  ;;  %v447_v28 = vsel %vm438_vm14, %v160_v15, %v400_v7 }
  0xa5   :  { %v232_v13 = vsel %vm221_vm12, %v227_v9, %v229_v52  ;;  %v222_v14 = vsel %vm221_vm12, %v216_v10, %v218_v50  ;;  %vm295_vm12 = vcmask 908288  }
  0xa6   :  { %v262_v17 = vsel %vm923_vm4, %v232_v13, 0  ;;  %v260_v18 = vsel %vm930_vm5, %v222_v14, 0 }
  0xa7   :  { %v408_v20 = vrot.slane %v262_v17, 4  ;;  %v406_v21 = vrot.slane %v260_v18, 4 }
  0xa8   :  { %v269_v25 = vpop.permute.xlu1 %268  ;;  %v267_v26 = vpop.permute.xlu0 %266 }
  0xa9   :  { %v272_v30 = vsel %vm270_vm8, %v267_v26, %v269_v25  ;;  %v453_v31 = vsel %vm451_vm15, %v441_v27, %v406_v21  ;;  %v457_v32 = vsel %vm451_vm15, %v447_v28, %v408_v20 }
  0xaa   :  { %v286_v33 = vsel %vm937_vm6, %v272_v30, 0 }
  0xab   :  { %v415_v35 = vrot.slane %v286_v33, 2 }
  0xac   :  { %v280_v38 = vpop.permute.xlu1 %279  ;;  %v278_v39 = vpop.permute.xlu0 %277 }
  0xad   :  { %v282_v42 = vsel %vm270_vm8, %v278_v39, %v280_v38  ;;  %v465_v43 = vsel %vm460_vm9, %v455_v40, %v415_v35 }
  0xae   :  { %v288_v44 = vsel %vm944_vm7, %v282_v42, 0  ;;  %529 = vmatprep.subr.bf16.mxu0 %v465_v43 }
  0xaf   :  { %v417_v45 = vrot.slane %v288_v44, 2 }
  0xb0   :  { %v276_v47 = vpop.permute.xlu1 %275  ;;  %v265_v48 = vpop.permute.xlu0 %264 }
  0xb1   :  { %v281_v50 = vsel %vm270_vm8, %v276_v47, %v278_v39  ;;  %v271_v51 = vsel %vm270_vm8, %v265_v48, %v267_v26  ;;  %v471_v52 = vsel %vm460_vm9, %v459_v49, %v417_v45 }
  0xb2   :  { %v287_v53 = vsel %vm916_vm3, %v281_v50, 0  ;;  %v285_v54 = vsel %vm894_vm0, %v271_v51, 0  ;;  %570 = vmatprep.subr.bf16.mxu1 %v471_v52 }
  0xb3   :  { %v416_v55 = vrot.slane %v287_v53, 2  ;;  %v414_v56 = vrot.slane %v285_v54, 2 }
  0xb4   :  { %v311_v57 = vpop.permute.xlu1 %310  ;;  %v309_v58 = vpop.permute.xlu0 %308 }
  0xb5   :  { %v462_v59 = vsel %vm460_vm9, %v453_v31, %v414_v56  ;;  %v468_v61 = vsel %vm460_vm9, %v457_v32, %v416_v55  ;;  %v314_v15 = vsel %vm312_vm10, %v309_v58, %v311_v57 }
  0xb6   :  { %530 = vmatpush1.bf16.msra.mxu0 %v462_v59  ;;  %571 = vmatpush1.bf16.msra.mxu1 %v468_v61  ;;  %v328_v18 = vsel %vm901_vm1, %v314_v15, 0 }
  0xb7   :  { %v423_v24 = vrot.slane %v328_v18, 6 }
  0xb8   :  { %v322_v63 = vpop.permute.xlu1 %321  ;;  %v320_v6 = vpop.permute.xlu0 %319 }
  0xb9   :  { %v324_v19 = vsel %vm312_vm10, %v320_v6, %v322_v63 }
  0xba   :  { %v330_v25 = vsel %vm909_vm2, %v324_v19, 0 }
  0xbb   :  { %v425_v31 = vrot.slane %v330_v25, 6 }
  0xbc   :  { %v318_v7 = vpop.permute.xlu1 %317  ;;  %v307_v8 = vpop.permute.xlu0 %306 }
  0xbd   :  { %v323_v35 = vsel %vm312_vm10, %v318_v7, %v320_v6  ;;  %v313_v36 = vsel %vm312_vm10, %v307_v8, %v309_v58 }
  0xbe   :  { %v329_v45 = vsel %vm923_vm4, %v323_v35, 0  ;;  %v327_v5 = vsel %vm930_vm5, %v313_v36, 0 }
  0xbf   :  { %v424_v52 = vrot.slane %v329_v45, 6  ;;  %v422_v53 = vrot.slane %v327_v5, 6 }
  0xc0   :  { %v336_v9 = vpop.permute.xlu1 %335  ;;  %v334_v10 = vpop.permute.xlu0 %333 }
  0xc1   :  { %v339_v20 = vsel %vm337_vm11, %v334_v10, %v336_v9 }
  0xc2   :  { %v353_v26 = vsel %vm937_vm6, %v339_v20, 0 }
  0xc3   :  { %v431_v32 = vrot.slane %v353_v26, 4  ;;  %v518_v26 = vld [vmem:[%s1069_s1] sm:$0xf]  ;;  %s721_s1 = smov [#allocation5]  }
  0xc4   :  { %v347_v11 = vpop.permute.xlu1 %346  ;;  %v345_v12 = vpop.permute.xlu0 %344  ;;  %s625_s8 = sshll.u32 %s721_s1, 4  ;;  %s626_s8 = int_to_ptr.vmem [resolvable:$true] %s625_s8 }
  0xc5   :  { %v349_v27 = vsel %vm337_vm11, %v345_v12, %v347_v11  ;;  %s683_s9 = scalar_lea.vmem %s626_s8, 512  ;;  %p688_p9 = scmp.lt.s32.totalorder %s626_s8, %s626_s8 }
  0xc6   :  { %v355_v4 = vsel %vm944_vm7, %v349_v27, 0  ;;  %p684_p8 = scmp.ne.s32.totalorder %s626_s8, %s683_s9  ;;  %p689_p10 = scmp.lt.s32.totalorder %s683_s9, %s683_s9 }
  0xc7   :  { %v433_v46 = vrot.slane %v355_v4, 4 }
  0xc8   :  { %v343_v13 = vpop.permute.xlu1 %342  ;;  %v332_v14 = vpop.permute.xlu0 %331  ;;  %p690_p11 = por %p689_p10, %p688_p9 }
  0xc9   :  { %v348_v38 = vsel %vm337_vm11, %v343_v13, %v345_v12  ;;  %v338_v39 = vsel %vm337_vm11, %v332_v14, %v334_v10 }
  0xca   :  { %v354_v48 = vsel %vm916_vm3, %v348_v38, 0  ;;  %v352_v49 = vsel %vm894_vm0, %v338_v39, 0  ;;  %vm379_vm0 = vcmask 769024   ;;  %p691_p12 = pnand %p690_p11, %p684_p8 }
  0xcb   :  { %v432_v57 = vrot.slane %v354_v48, 4  ;;  %v430_v58 = vrot.slane %v352_v49, 4 }
  0xcc   :  { %v294_v16 = vpop.permute.xlu1 %293  ;;  %v292_v17 = vpop.permute.xlu0 %291 }
  0xcd   :  { %v297_v23 = vsel %vm295_vm12, %v292_v17, %v294_v16 }
  0xce   :  { %v478_v28 = vsel %vm438_vm14, %v297_v23, %v423_v24 }
  0xcf   :  { %v488_v40 = vsel %vm451_vm15, %v478_v28, %v431_v32 }
  0xd0   :  { %v303_v21 = vpop.permute.xlu1 %302  ;;  %v301_v22 = vpop.permute.xlu0 %300 }
  0xd1   :  { %v305_v33 = vsel %vm295_vm12, %v301_v22, %v303_v21 }
  0xd2   :  { %v484_v41 = vsel %vm438_vm14, %v305_v33, %v425_v31 }
  0xd3   :  { %v492_v51 = vsel %vm451_vm15, %v484_v41, %v433_v46 }
  0xd4   :  { %v361_v29 = vpop.permute.xlu1 %360  ;;  %v359_v30 = vpop.permute.xlu0 %358 }
  0xd5   :  { %v364_v34 = vsel %vm362_vm13, %v359_v30, %v361_v29 }
  0xd6   :  { %v435_v37 = vrot.slane %v364_v34, 2 }
  0xd8   :  { %v370_v42 = vpop.permute.xlu1 %369  ;;  %v368_v43 = vpop.permute.xlu0 %367  ;;  %v497_v44 = vsel %vm460_vm9, %v488_v40, %v435_v37 }
  0xd9   :  { %v372_v47 = vsel %vm362_vm13, %v368_v43, %v370_v42  ;;  %531 = vmatprep.subr.bf16.mxu0 %v497_v44 }
  0xda   :  { %v437_v50 = vrot.slane %v372_v47, 2 }
  0xdc   :  { %v299_v54 = vpop.permute.xlu1 %298  ;;  %v290_v55 = vpop.permute.xlu0 %289  ;;  %v503_v56 = vsel %vm460_vm9, %v492_v51, %v437_v50 }
  0xdd   :  { %v304_v59 = vsel %vm295_vm12, %v299_v54, %v301_v22  ;;  %v296_v61 = vsel %vm295_vm12, %v290_v55, %v292_v17  ;;  %572 = vmatprep.subr.bf16.mxu1 %v503_v56 }
  0xde   :  { %v481_v1 = vsel %vm438_vm14, %v304_v59, %v424_v52  ;;  %v475_v60 = vsel %vm438_vm14, %v296_v61, %v422_v53 }
  0xdf   :  { %v486_v63 = vsel %vm451_vm15, %v475_v60, %v430_v58  ;;  %v490_v6 = vsel %vm451_vm15, %v481_v1, %v432_v57  ;;  %vm525_vm15 = vcmask 392192  }
  0xe0   :  { %v366_v7 = vpop.permute.xlu1 %365  ;;  %v357_v8 = vpop.permute.xlu0 %356 }
  0xe1   :  { %v371_v9 = vsel %vm362_vm13, %v366_v7, %v368_v43  ;;  %v363_v10 = vsel %vm362_vm13, %v357_v8, %v359_v30 }
  0xe2   :  { %v436_v11 = vrot.slane %v371_v9, 2  ;;  %v434_v12 = vrot.slane %v363_v10, 2 }
  0xe4   :  { %v376_v13 = vpop.permute.xlu1 %375  ;;  %v374_v14 = vpop.permute.xlu0 %373  ;;  %v494_v15 = vsel %vm460_vm9, %v486_v63, %v434_v12  ;;  %v500_v16 = vsel %vm460_vm9, %v490_v6, %v436_v11 }
  0xe5   :  { %v380_v17 = vsel %vm379_vm0, %v374_v14, %v376_v13  ;;  %532 = vmatpush1.bf16.msra.mxu0 %v494_v15  ;;  %573 = vmatpush1.bf16.msra.mxu1 %v500_v16 }
  0xe6   :  { %v394_v20 = vsel %vm930_vm5, %v380_v17, 0 }
  0xe7   :  { %v507_v23 = vsel %vm438_vm14, %v394_v20, 0 }
  0xe8   :  { %v385_v18 = vpop.permute.xlu1 %384  ;;  %v378_v19 = vpop.permute.xlu0 %377 }
  0xe9   :  { %v381_v21 = vsel %vm379_vm0, %v376_v13, %v378_v19 }
  0xea   :  { %v395_v22 = vsel %vm901_vm1, %v381_v21, 0 }
  0xeb   :  { %639 = vmatprep.subr.msk.bf16.mxu0 %vm438_vm14, %v395_v22 }
  0xec   :  { %v389_v24 = vpop.permute.xlu1 %388  ;;  %v387_v25 = vpop.permute.xlu0 %386  ;;  %534 = vmatpush1.bf16.msra.mxu0 %v507_v23 }
  0xed   :  { %v390_v3 = vsel %vm379_vm0, %v385_v18, %v387_v25  ;;  %v391_v27 = vsel %vm379_vm0, %v387_v25, %v389_v24 }
  0xee   :  { %v397_v62 = vsel %vm909_vm2, %v391_v27, 0  ;;  %v396_v28 = vsel %vm923_vm4, %v390_v3, 0 }
  0xef   :  { %641 = vmatprep.subr.msk.bf16.mxu1 %vm438_vm14, %v397_v62  ;;  %640 = vmatmul.mubr.msk.bf16.vlgmr.msra.gmra.mrb[0].mxu0 %vm525_vm15, %v518_v26  ;;  %v513_v29 = vsel %vm438_vm14, %v396_v28, 0 }
  0xf0   :  { %575 = vmatpush1.bf16.msra.mxu1 %v513_v29 }
  0xf3   :  { %642 = vmatmul.mubr.msk.bf16.vlgmr.msra.gmra.mrb[0].mxu1 %vm525_vm15, %v518_v26 }
  0xfd   :  { %v523_v30 = vpop.permute.xlu0 %522 }
 0x1c2   :  { %v563_v31 = vpop.f32.mrb[0].mxu0 }
 0x1c3   :  { %v565_v32 = vpop.f32.mrb[1].mxu0  ;;  %v564_v33 = vadd.f32 %v563_v31, %v523_v30 }
 0x1c4   :  { %v567_v34 = vpop.f32.mrb[2].mxu0  ;;  %v566_v35 = vadd.f32 %v565_v32, %v523_v30 }
 0x1c5   :  { %v611_v36 = vmax.f32 %v564_v33, 0.0  ;;  %v568_v4 = vpop.f32.mrb[3].mxu0 }
 0x1c6   :  { %v612_v0 = vmax.f32 %v566_v35, 0.0  ;;  %v604_v37 = vpop.f32.mrb[0].mxu1 }
 0x1c7   :  { %615 = vst [vmem:[#allocation5] sm:$0xff] %v611_v36  ;;  %v605_v2 = vadd.f32 %v604_v37, %v523_v30  ;;  %v606_v38 = vpop.f32.mrb[1].mxu1 }
 0x1c8   :  { %616 = vst [vmem:[#allocation5 + $0x8] sm:$0xff] %v612_v0  ;;  %v607_v39 = vadd.f32 %v606_v38, %v523_v30  ;;  %v608_v40 = vpop.f32.mrb[2].mxu1 }
 0x1c9   :  { %v613_v41 = vmax.f32 %v605_v2, 0.0  ;;  %v609_v42 = vpop.f32.mrb[3].mxu1 }
 0x1ca   :  { %v614_v43 = vmax.f32 %v607_v39, 0.0 }
 0x1cb   :  { %618 = vst [vmem:[#allocation5 + $0x10] sm:$0xff] %v613_v41 }
 0x1cc   :  { %619 = vst [vmem:[#allocation5 + $0x18] sm:$0xff] %v614_v43 }
 0x1cd   :  { %694 = shalt.err (!%p691_p12)
}
 0x1ce   :  { %s695_s12 = scalar_lea.hbm %s1071_s3, 512 }
 0x1cf   :  { %p696_p13 = scmp.ne.s32.totalorder %s1071_s3, %s695_s12  ;;  %p699_p0 = scmp.lt.u32.totalorder %s695_s12, %s1071_s3 }
 0x1d1   :  { %p701_p1 = pnand %p699_p0, %p696_p13 }
 0x1d3   :  { %704 = shalt.err (!%p701_p1)
}
 0x1d4   :  { %s722_s17 = smov 256   ;;  %s723_s18 = smov 16  }
 0x1d5   :  { %631 = dma.vmem_to_hbm [thread:$0]  %s626_s8, 512, %s1071_s3, [#allocation4], %s722_s17, %s722_s17, %s723_s18  }
 0x1d6   :  { %707 = dma.done.wait [#allocation4], 512  }
 0x1d7   :  { %708 = vsyncadd [#allocation4], 4294966784 }
 0x1d8   :  { %635 = vsyncpa [#allocation3], 1 }
 0x1d9   :  { %636 = vsyncpa [#allocation4], 1 }

</bundles_post_ra>
